<compile_context>
chip_gen: v7x
topology: tpu7x:2x2x1
jax: 0.10.0
libtpu: 0.0.40
codegen_flags: <defaults>
</compile_context>

<pallas_src>
import functools

import jax
import jax.numpy as jnp
from jax import lax
from jax.experimental import pallas as pl
from jax.experimental.pallas import tpu as pltpu

_EPS_NORM = 1e-5   # epsilon inside max_norm
_EPS_IOU = 1e-8    # epsilon in the IoU denominators


def _round_up(value, multiple):
    return (value + multiple - 1) // multiple * multiple


def _pick_lane_tile(hw, rows, n_batch, itemsize, max_tile_lanes):
    """HW (lane) tile: multiple of 128, sized so the double-buffered input
    blocks stay within a few MiB of VMEM, or the full row if it already fits."""
    rows_pad = _round_up(rows, 8)
    n_pad = _round_up(n_batch, 8)
    budget = 12 * 1024 * 1024                        # input-block VMEM budget
    per_lane = 2 * (rows_pad + n_pad) * itemsize     # double-buffered x + target
    tile = max(128, (budget // per_lane) // 128 * 128)
    tile = min(tile, max(128, max_tile_lanes // 128 * 128))
    if hw <= tile:
        return hw                                    # single full (legal) block
    return tile


def _miou_sums_kernel(x_ref, t_ref, a_ref, b_ref, tsum_ref,
                      max_s, min_s, sub_s, inv_s, *,
                      n, c, hw, tile, num_tiles, needs_mask):
    """Fused two-pass kernel over grid (pass, hw_tile).

    pass 0: running per-row max/min of relu(x); at the last tile the per-row
            constants sub = min+e and inv = 1/(max-min+e) are hoisted.
    pass 1: streaming sums A = sum(norm), B = sum(norm*t0), T = sum(t0).
    """
    p = pl.program_id(0)
    j = pl.program_id(1)

    @pl.when((p == 0) & (j == 0))
    def _init():
        max_s[...] = jnp.zeros_like(max_s)
        min_s[...] = jnp.full(min_s.shape, jnp.inf, dtype=min_s.dtype)
        a_ref[...] = jnp.zeros_like(a_ref)
        b_ref[...] = jnp.zeros_like(b_ref)
        tsum_ref[...] = jnp.zeros_like(tsum_ref)

    if needs_mask:   # partial last tile: exclude padded lanes
        lane = lax.broadcasted_iota(jnp.int32, (1, tile), 1)
        valid = j * tile + lane < hw
    else:
        valid = None

    @pl.when(p == 0)
    def _pass_minmax():
        q = jnp.maximum(x_ref[...].astype(jnp.float32), 0.0)    # relu, (N*C, tile)
        if valid is not None:
            q_max = jnp.where(valid, q, 0.0)    # relu(x) >= 0: 0 never wins the max
            q_min = jnp.where(valid, q, jnp.inf)
        else:
            q_max = q_min = q
        max_s[...] = jnp.maximum(max_s[...], jnp.max(q_max, axis=-1, keepdims=True))
        min_s[...] = jnp.minimum(min_s[...], jnp.min(q_min, axis=-1, keepdims=True))

        @pl.when(j == num_tiles - 1)
        def _hoist_coefficients():
            sub_s[...] = min_s[...] + _EPS_NORM
            inv_s[...] = 1.0 / (max_s[...] - min_s[...] + _EPS_NORM)

    @pl.when(p == 1)
    def _pass_sums():
        x = x_ref[...].astype(jnp.float32)      # (N*C, tile), cast after DMA
        t = t_ref[...].astype(jnp.float32)      # (N,   tile)
        if valid is not None:
            x = jnp.where(valid, x, 0.0)        # -> norm == 0 on padded lanes
            t = jnp.where(valid, t, 0.0)

        # norm = relu(relu(x) - (min+e)) / (max-min+e) == relu(x - (min+e)) * inv
        # (inner relu is redundant because min + e > 0; divisor hoisted to inv).
        norm = jnp.maximum(x - sub_s[...], 0.0) * inv_s[...]

        a_ref[...] += jnp.sum(norm, axis=-1, keepdims=True)         # A, all rows
        tsum_ref[...] += jnp.sum(t, axis=-1, keepdims=True)         # T, per batch
        # B[n,c] = sum_hw norm[n,c] * target0[n]: broadcast target0 row i over
        # the C channel rows of batch element i (small static unroll over N).
        b_parts = []
        for i in range(n):
            rows = slice(i * c, (i + 1) * c)
            b_parts.append(jnp.sum(norm[rows, :] * t[i:i + 1, :],
                                   axis=-1, keepdims=True))
        b_ref[...] += jnp.concatenate(b_parts, axis=0)


def miou_loss(inputs, target, cls_label, n_foreground=2, max_tile_lanes=65536):
    """JAX/Pallas equivalent of mIoULoss.forward(inputs, target, cls_label)."""
    N, C, H, W = inputs.shape
    assert C == n_foreground + 1, "inputs must be (N, n_foreground + 1, H, W)"
    HW = H * W
    R = N * C

    # Free reshapes; keep the native dtype (e.g. bf16 stays bf16 -> half DMA).
    x2 = inputs.reshape(R, HW)
    t0 = target[:, 0].reshape(N, HW)

    itemsize = jnp.dtype(x2.dtype).itemsize
    tile = _pick_lane_tile(HW, R, N, itemsize, max_tile_lanes)
    num_tiles = pl.cdiv(HW, tile)
    needs_mask = (HW % tile) != 0
    x_passes = 1 if num_tiles == 1 else 2    # resident block => single HBM read

    kernel = functools.partial(
        _miou_sums_kernel, n=N, c=C, hw=HW, tile=tile,
        num_tiles=num_tiles, needs_mask=needs_mask)

    a_sum, b_sum, t_sum = pl.pallas_call(
        kernel,
        grid=(2, num_tiles),
        in_specs=[
            pl.BlockSpec((R, tile), lambda p, j: (0, j)),
            # target is only read in pass 1; block (0, 0) during pass 0 keeps it
            # from being streamed twice over the grid.
            pl.BlockSpec((N, tile), lambda p, j: (0, j * p)),
        ],
        out_specs=[
            pl.BlockSpec((R, 1), lambda p, j: (0, 0)),
            pl.BlockSpec((R, 1), lambda p, j: (0, 0)),
            pl.BlockSpec((N, 1), lambda p, j: (0, 0)),
        ],
        out_shape=[
            jax.ShapeDtypeStruct((R, 1), jnp.float32),
            jax.ShapeDtypeStruct((R, 1), jnp.float32),
            jax.ShapeDtypeStruct((N, 1), jnp.float32),
        ],
        scratch_shapes=[pltpu.VMEM((R, 1), jnp.float32)] * 4,   # max, min, sub, inv
        compiler_params=pltpu.CompilerParams(
            dimension_semantics=("arbitrary", "arbitrary"),
            vmem_limit_bytes=32 * 1024 * 1024),
        cost_estimate=pl.CostEstimate(
            flops=10 * R * HW, transcendentals=0,
            bytes_accessed=(x_passes * R * HW * itemsize
                            + N * HW * jnp.dtype(t0.dtype).itemsize
                            + (2 * R + N) * 4)),
    )(x2, t0)

    # ---------- tiny (N, C) epilogue, exactly the reference formulas ----------
    A = a_sum.reshape(N, C)
    B = b_sum.reshape(N, C)
    T = t_sum.reshape(N)

    cls = cls_label.astype(jnp.float32)
    n_fg = n_foreground
    inter_fg = cls[:, :n_fg] * B[:, :n_fg]                       # (N, n_fg)
    inter_bg = cls[:, n_fg] * (A[:, n_fg] - B[:, n_fg])          # (N,)
    union_fg = A[:, :n_fg]                                       # (N, n_fg)
    union_bg = (float(HW) - T + B[:, n_fg])[:, None]             # (N, 1)

    # NOTE: (N,) / (N, 1) broadcasts to (N, N) -- this reproduces the PyTorch
    # module's behaviour exactly and is kept on purpose.
    loss_bg = inter_bg / (union_bg + _EPS_IOU)
    loss_fg = inter_fg / (union_fg + _EPS_IOU)
    loss = jnp.mean(loss_bg) + jnp.mean(loss_fg)
    # TODO(synk): the `if -torch.mean(loss) > 0: pdb.set_trace()` debug hook has
    # no kernel equivalent; it never changes the returned value and is omitted.
    return -loss


def _miou_loss_reference(inputs, target, cls_label, n_foreground):
    """Pure-jnp mirror of the PyTorch module, used only for verification."""
    e = 1e-5
    N, C, H, W = inputs.shape
    p = jnp.maximum(inputs.astype(jnp.float32), 0.0)
    max_v = jnp.max(p.reshape(N, C, -1), axis=-1).reshape(N, C, 1, 1)
    min_v = jnp.min(p.reshape(N, C, -1), axis=-1).reshape(N, C, 1, 1)
    norm = jnp.maximum(p - min_v - e, 0.0) / (max_v - min_v + e)

    t0 = target[:, 0].astype(jnp.float32)
    te = jnp.concatenate(
        [jnp.broadcast_to(t0[:, None], (N, n_foreground, H, W)),
         (1.0 - t0)[:, None]], axis=1)
    cls = cls_label.astype(jnp.float32)[:, :, None, None]
    inter = (norm * te * cls).reshape(N, C, -1).sum(-1)
    union_bg = (norm[:, -1] + te[:, -1] - norm[:, -1] * te[:, -1]
                ).reshape(N, 1, -1).sum(-1)
    loss_bg = inter[:, -1] / (union_bg + 1e-8)
    union_fg = norm[:, :-1].reshape(N, n_foreground, -1).sum(-1)
    loss_fg = inter[:, :-1] / (union_fg + 1e-8)
    return -(jnp.mean(loss_bg) + jnp.mean(loss_fg))


if __name__ == "__main__":
    key = jax.random.PRNGKey(0)
    k1, k2, k3 = jax.random.split(key, 3)

    N, n_fg = 2, 2
    C = n_fg + 1

    # Config 1 (H=16, W=18, max_tile_lanes=128) forces a multi-tile HW grid
    # with a partial (masked) last tile; config 2 exercises the resident
    # single-tile path where the input is DMA'd from HBM exactly once.
    for (H, W, max_lanes) in [(16, 18, 128), (16, 16, 65536)]:
        inputs = jax.random.normal(k1, (N, C, H, W), dtype=jnp.float32)
        target = (jax.random.uniform(k2, (N, 1, H, W)) > 0.5).astype(jnp.float32)
        cls_label = (jax.random.uniform(k3, (N, C)) > 0.3).astype(jnp.float32)

        loss_fn = jax.jit(functools.partial(miou_loss, n_foreground=n_fg,
                                            max_tile_lanes=max_lanes))
        out = loss_fn(inputs, target, cls_label)
        jax.block_until_ready(out)

        ref = _miou_loss_reference(inputs, target, cls_label, n_fg)
        assert jnp.allclose(out, ref, rtol=1e-4, atol=1e-5), (H, W, out, ref)

    print("KERNEL_OK")
</pallas_src>

<mosaic_0001>
module attributes {stable_mosaic.version = 11 : i64} {
  func.func @_miou_sums_kernel(%arg0: i32, %arg1: i32, %arg2: memref<6x128xf32, #tpu.memory_space<vmem>>, %arg3: memref<2x128xf32, #tpu.memory_space<vmem>>, %arg4: memref<6x1xf32, #tpu.memory_space<vmem>>, %arg5: memref<6x1xf32, #tpu.memory_space<vmem>>, %arg6: memref<2x1xf32, #tpu.memory_space<vmem>>, %arg7: memref<6x1xf32, #tpu.memory_space<vmem>>, %arg8: memref<6x1xf32, #tpu.memory_space<vmem>>, %arg9: memref<6x1xf32, #tpu.memory_space<vmem>>, %arg10: memref<6x1xf32, #tpu.memory_space<vmem>>) attributes {dimension_semantics = [#tpu.dimension_semantics<arbitrary>, #tpu.dimension_semantics<arbitrary>], iteration_bounds = array<i64: 2, 3>, scalar_prefetch = 0 : i64, scratch_operands = 4 : i64, tpu.core_type = #tpu.core_type<tc>, window_params = [{transform_indices = @transform_0, window_bounds = array<i64: 6, 128>}, {transform_indices = @transform_1, window_bounds = array<i64: 2, 128>}, {pipeline_mode = #tpu.pipeline_mode<synchronous>, transform_indices = @transform_2, window_bounds = array<i64: 6, 1>}, {pipeline_mode = #tpu.pipeline_mode<synchronous>, transform_indices = @transform_3, window_bounds = array<i64: 6, 1>}, {pipeline_mode = #tpu.pipeline_mode<synchronous>, transform_indices = @transform_4, window_bounds = array<i64: 2, 1>}]} {
    %c0_i32 = arith.constant 0 : i32
    %0 = arith.cmpi eq, %arg0, %c0_i32 : i32
    %c0_i32_0 = arith.constant 0 : i32
    %1 = arith.cmpi eq, %arg1, %c0_i32_0 : i32
    %2 = arith.andi %0, %1 : i1
    %3 = arith.extui %2 : i1 to i32
    %c0_i32_1 = arith.constant 0 : i32
    %4 = arith.cmpi ne, %3, %c0_i32_1 : i32
    scf.if %4 {
      %cst = arith.constant 0.000000e+00 : f32
      %17 = vector.broadcast %cst : f32 to vector<6x1xf32>
      %c0 = arith.constant 0 : index
      %c0_5 = arith.constant 0 : index
      %18 = vector.load %arg7[%c0, %c0_5] : memref<6x1xf32, #tpu.memory_space<vmem>>, vector<6x1xf32>
      tpu.vector_store %arg7[%c0, %c0_5], %17 {strides = array<i32>} : memref<6x1xf32, #tpu.memory_space<vmem>>, vector<6x1xf32>,
      %cst_6 = arith.constant 0x7F800000 : f32
      %19 = vector.broadcast %cst_6 : f32 to vector<6x1xf32>
      %c0_7 = arith.constant 0 : index
      %c0_8 = arith.constant 0 : index
      %20 = vector.load %arg8[%c0_7, %c0_8] : memref<6x1xf32, #tpu.memory_space<vmem>>, vector<6x1xf32>
      tpu.vector_store %arg8[%c0_7, %c0_8], %19 {strides = array<i32>} : memref<6x1xf32, #tpu.memory_space<vmem>>, vector<6x1xf32>,
      %cst_9 = arith.constant 0.000000e+00 : f32
      %21 = vector.broadcast %cst_9 : f32 to vector<6x1xf32>
      %c0_10 = arith.constant 0 : index
      %c0_11 = arith.constant 0 : index
      %22 = vector.load %arg4[%c0_10, %c0_11] : memref<6x1xf32, #tpu.memory_space<vmem>>, vector<6x1xf32>
      tpu.vector_store %arg4[%c0_10, %c0_11], %21 {strides = array<i32>} : memref<6x1xf32, #tpu.memory_space<vmem>>, vector<6x1xf32>,
      %cst_12 = arith.constant 0.000000e+00 : f32
      %23 = vector.broadcast %cst_12 : f32 to vector<6x1xf32>
      %c0_13 = arith.constant 0 : index
      %c0_14 = arith.constant 0 : index
      %24 = vector.load %arg5[%c0_13, %c0_14] : memref<6x1xf32, #tpu.memory_space<vmem>>, vector<6x1xf32>
      tpu.vector_store %arg5[%c0_13, %c0_14], %23 {strides = array<i32>} : memref<6x1xf32, #tpu.memory_space<vmem>>, vector<6x1xf32>,
      %cst_15 = arith.constant 0.000000e+00 : f32
      %25 = vector.broadcast %cst_15 : f32 to vector<2x1xf32>
      %c0_16 = arith.constant 0 : index
      %c0_17 = arith.constant 0 : index
      %26 = vector.load %arg6[%c0_16, %c0_17] : memref<2x1xf32, #tpu.memory_space<vmem>>, vector<2x1xf32>
      tpu.vector_store %arg6[%c0_16, %c0_17], %25 {strides = array<i32>} : memref<2x1xf32, #tpu.memory_space<vmem>>, vector<2x1xf32>,
    } else {
    }
    %5 = tpu.iota {dimensions = array<i32: 1>} : vector<1x128xi32>
    %c128_i32 = arith.constant 128 : i32
    %6 = arith.muli %arg1, %c128_i32 : i32
    %7 = vector.broadcast %6 : i32 to vector<1x128xi32>
    %8 = arith.addi %7, %5 : vector<1x128xi32>
    %c288_i32 = arith.constant 288 : i32
    %9 = vector.broadcast %c288_i32 : i32 to vector<1x128xi32>
    %10 = arith.cmpi slt, %8, %9 : vector<1x128xi32>
    %c0_i32_2 = arith.constant 0 : i32
    %11 = arith.cmpi eq, %arg0, %c0_i32_2 : i32
    %12 = arith.extui %11 : i1 to i32
    %c0_i32_3 = arith.constant 0 : i32
    %13 = arith.cmpi ne, %12, %c0_i32_3 : i32
    scf.if %13 {
      %c0 = arith.constant 0 : index
      %c0_5 = arith.constant 0 : index
      %17 = vector.load %arg2[%c0, %c0_5] : memref<6x128xf32, #tpu.memory_space<vmem>>, vector<6x128xf32>
      %cst = arith.constant 0.000000e+00 : f32
      %18 = vector.broadcast %cst : f32 to vector<6x128xf32>
      %19 = arith.maximumf %17, %18 : vector<6x128xf32>
      %cst_6 = arith.constant 0.000000e+00 : f32
      %20 = vector.shape_cast %10 : vector<1x128xi1> to vector<1x128xi1>
      %21 = vector.broadcast %20 : vector<1x128xi1> to vector<6x128xi1>
      %22 = vector.broadcast %cst_6 : f32 to vector<6x128xf32>
      %23 = arith.select %21, %19, %22 : vector<6x128xi1>, vector<6x128xf32>
      %cst_7 = arith.constant 0x7F800000 : f32
      %24 = vector.shape_cast %10 : vector<1x128xi1> to vector<1x128xi1>
      %25 = vector.broadcast %24 : vector<1x128xi1> to vector<6x128xi1>
      %26 = vector.broadcast %cst_7 : f32 to vector<6x128xf32>
      %27 = arith.select %25, %19, %26 : vector<6x128xi1>, vector<6x128xf32>
      %c0_8 = arith.constant 0 : index
      %c0_9 = arith.constant 0 : index
      %28 = vector.load %arg7[%c0_8, %c0_9] : memref<6x1xf32, #tpu.memory_space<vmem>>, vector<6x1xf32>
      %cst_10 = arith.constant dense<0xFF800000> : vector<6xf32>
      %29 = vector.multi_reduction <maximumf>, %23, %cst_10 [1] : vector<6x128xf32> to vector<6xf32>
      %30 = vector.shape_cast %29 : vector<6xf32> to vector<6x1xf32>
      %31 = arith.maximumf %28, %30 : vector<6x1xf32>
      %c0_11 = arith.constant 0 : index
      %c0_12 = arith.constant 0 : index
      %32 = vector.load %arg7[%c0_11, %c0_12] : memref<6x1xf32, #tpu.memory_space<vmem>>, vector<6x1xf32>
      tpu.vector_store %arg7[%c0_11, %c0_12], %31 {strides = array<i32>} : memref<6x1xf32, #tpu.memory_space<vmem>>, vector<6x1xf32>,
      %c0_13 = arith.constant 0 : index
      %c0_14 = arith.constant 0 : index
      %33 = vector.load %arg8[%c0_13, %c0_14] : memref<6x1xf32, #tpu.memory_space<vmem>>, vector<6x1xf32>
      %cst_15 = arith.constant dense<0x7F800000> : vector<6xf32>
      %34 = vector.multi_reduction <minimumf>, %27, %cst_15 [1] : vector<6x128xf32> to vector<6xf32>
      %35 = vector.shape_cast %34 : vector<6xf32> to vector<6x1xf32>
      %36 = arith.minimumf %33, %35 : vector<6x1xf32>
      %c0_16 = arith.constant 0 : index
      %c0_17 = arith.constant 0 : index
      %37 = vector.load %arg8[%c0_16, %c0_17] : memref<6x1xf32, #tpu.memory_space<vmem>>, vector<6x1xf32>
      tpu.vector_store %arg8[%c0_16, %c0_17], %36 {strides = array<i32>} : memref<6x1xf32, #tpu.memory_space<vmem>>, vector<6x1xf32>,
      %c2_i32 = arith.constant 2 : i32
      %38 = arith.cmpi eq, %arg1, %c2_i32 : i32
      %39 = arith.extui %38 : i1 to i32
      %c0_i32_18 = arith.constant 0 : i32
      %40 = arith.cmpi ne, %39, %c0_i32_18 : i32
      scf.if %40 {
        %c0_19 = arith.constant 0 : index
        %c0_20 = arith.constant 0 : index
        %41 = vector.load %arg8[%c0_19, %c0_20] : memref<6x1xf32, #tpu.memory_space<vmem>>, vector<6x1xf32>
        %cst_21 = arith.constant 9.99999974E-6 : f32
        %42 = vector.broadcast %cst_21 : f32 to vector<6x1xf32>
        %43 = arith.addf %41, %42 : vector<6x1xf32>
        %c0_22 = arith.constant 0 : index
        %c0_23 = arith.constant 0 : index
        %44 = vector.load %arg9[%c0_22, %c0_23] : memref<6x1xf32, #tpu.memory_space<vmem>>, vector<6x1xf32>
        tpu.vector_store %arg9[%c0_22, %c0_23], %43 {strides = array<i32>} : memref<6x1xf32, #tpu.memory_space<vmem>>, vector<6x1xf32>,
        %c0_24 = arith.constant 0 : index
        %c0_25 = arith.constant 0 : index
        %45 = vector.load %arg7[%c0_24, %c0_25] : memref<6x1xf32, #tpu.memory_space<vmem>>, vector<6x1xf32>
        %c0_26 = arith.constant 0 : index
        %c0_27 = arith.constant 0 : index
        %46 = vector.load %arg8[%c0_26, %c0_27] : memref<6x1xf32, #tpu.memory_space<vmem>>, vector<6x1xf32>
        %47 = arith.subf %45, %46 : vector<6x1xf32>
        %cst_28 = arith.constant 9.99999974E-6 : f32
        %48 = vector.broadcast %cst_28 : f32 to vector<6x1xf32>
        %49 = arith.addf %47, %48 : vector<6x1xf32>
        %cst_29 = arith.constant 1.000000e+00 : f32
        %50 = vector.broadcast %cst_29 : f32 to vector<6x1xf32>
        %51 = arith.divf %50, %49 : vector<6x1xf32>
        %c0_30 = arith.constant 0 : index
        %c0_31 = arith.constant 0 : index
        %52 = vector.load %arg10[%c0_30, %c0_31] : memref<6x1xf32, #tpu.memory_space<vmem>>, vector<6x1xf32>
        tpu.vector_store %arg10[%c0_30, %c0_31], %51 {strides = array<i32>} : memref<6x1xf32, #tpu.memory_space<vmem>>, vector<6x1xf32>,
      } else {
      }
    } else {
    }
    %c1_i32 = arith.constant 1 : i32
    %14 = arith.cmpi eq, %arg0, %c1_i32 : i32
    %15 = arith.extui %14 : i1 to i32
    %c0_i32_4 = arith.constant 0 : i32
    %16 = arith.cmpi ne, %15, %c0_i32_4 : i32
    scf.if %16 {
      %c0 = arith.constant 0 : index
      %c0_5 = arith.constant 0 : index
      %17 = vector.load %arg2[%c0, %c0_5] : memref<6x128xf32, #tpu.memory_space<vmem>>, vector<6x128xf32>
      %c0_6 = arith.constant 0 : index
      %c0_7 = arith.constant 0 : index
      %18 = vector.load %arg3[%c0_6, %c0_7] : memref<2x128xf32, #tpu.memory_space<vmem>>, vector<2x128xf32>
      %cst = arith.constant 0.000000e+00 : f32
      %19 = vector.shape_cast %10 : vector<1x128xi1> to vector<1x128xi1>
      %20 = vector.broadcast %19 : vector<1x128xi1> to vector<6x128xi1>
      %21 = vector.broadcast %cst : f32 to vector<6x128xf32>
      %22 = arith.select %20, %17, %21 : vector<6x128xi1>, vector<6x128xf32>
      %cst_8 = arith.constant 0.000000e+00 : f32
      %23 = vector.shape_cast %10 : vector<1x128xi1> to vector<1x128xi1>
      %24 = vector.broadcast %23 : vector<1x128xi1> to vector<2x128xi1>
      %25 = vector.broadcast %cst_8 : f32 to vector<2x128xf32>
      %26 = arith.select %24, %18, %25 : vector<2x128xi1>, vector<2x128xf32>
      %c0_9 = arith.constant 0 : index
      %c0_10 = arith.constant 0 : index
      %27 = vector.load %arg9[%c0_9, %c0_10] : memref<6x1xf32, #tpu.memory_space<vmem>>, vector<6x1xf32>
      %28 = vector.broadcast %27 : vector<6x1xf32> to vector<6x128xf32>
      %29 = arith.subf %22, %28 : vector<6x128xf32>
      %cst_11 = arith.constant 0.000000e+00 : f32
      %30 = vector.broadcast %cst_11 : f32 to vector<6x128xf32>
      %31 = arith.maximumf %29, %30 : vector<6x128xf32>
      %c0_12 = arith.constant 0 : index
      %c0_13 = arith.constant 0 : index
      %32 = vector.load %arg10[%c0_12, %c0_13] : memref<6x1xf32, #tpu.memory_space<vmem>>, vector<6x1xf32>
      %33 = vector.broadcast %32 : vector<6x1xf32> to vector<6x128xf32>
      %34 = arith.mulf %31, %33 : vector<6x128xf32>
      %c0_14 = arith.constant 0 : index
      %c0_15 = arith.constant 0 : index
      %35 = vector.load %arg4[%c0_14, %c0_15] : memref<6x1xf32, #tpu.memory_space<vmem>>, vector<6x1xf32>
      %cst_16 = arith.constant dense<0.000000e+00> : vector<6xf32>
      %36 = vector.multi_reduction <add>, %34, %cst_16 [1] : vector<6x128xf32> to vector<6xf32>
      %37 = vector.shape_cast %36 : vector<6xf32> to vector<6x1xf32>
      %38 = arith.addf %35, %37 : vector<6x1xf32>
      %c0_17 = arith.constant 0 : index
      %c0_18 = arith.constant 0 : index
      %39 = vector.load %arg4[%c0_17, %c0_18] : memref<6x1xf32, #tpu.memory_space<vmem>>, vector<6x1xf32>
      tpu.vector_store %arg4[%c0_17, %c0_18], %38 {strides = array<i32>} : memref<6x1xf32, #tpu.memory_space<vmem>>, vector<6x1xf32>,
      %c0_19 = arith.constant 0 : index
      %c0_20 = arith.constant 0 : index
      %40 = vector.load %arg6[%c0_19, %c0_20] : memref<2x1xf32, #tpu.memory_space<vmem>>, vector<2x1xf32>
      %cst_21 = arith.constant dense<0.000000e+00> : vector<2xf32>
      %41 = vector.multi_reduction <add>, %26, %cst_21 [1] : vector<2x128xf32> to vector<2xf32>
      %42 = vector.shape_cast %41 : vector<2xf32> to vector<2x1xf32>
      %43 = arith.addf %40, %42 : vector<2x1xf32>
      %c0_22 = arith.constant 0 : index
      %c0_23 = arith.constant 0 : index
      %44 = vector.load %arg6[%c0_22, %c0_23] : memref<2x1xf32, #tpu.memory_space<vmem>>, vector<2x1xf32>
      tpu.vector_store %arg6[%c0_22, %c0_23], %43 {strides = array<i32>} : memref<2x1xf32, #tpu.memory_space<vmem>>, vector<2x1xf32>,
      %45 = vector.extract_strided_slice %34 {offsets = [0, 0], sizes = [3, 128], strides = [1, 1]} : vector<6x128xf32> to vector<3x128xf32>
      %46 = vector.extract_strided_slice %26 {offsets = [0, 0], sizes = [1, 128], strides = [1, 1]} : vector<2x128xf32> to vector<1x128xf32>
      %47 = vector.broadcast %46 : vector<1x128xf32> to vector<3x128xf32>
      %48 = arith.mulf %45, %47 : vector<3x128xf32>
      %cst_24 = arith.constant dense<0.000000e+00> : vector<3xf32>
      %49 = vector.multi_reduction <add>, %48, %cst_24 [1] : vector<3x128xf32> to vector<3xf32>
      %50 = vector.shape_cast %49 : vector<3xf32> to vector<3x1xf32>
      %51 = vector.extract_strided_slice %34 {offsets = [3, 0], sizes = [3, 128], strides = [1, 1]} : vector<6x128xf32> to vector<3x128xf32>
      %52 = vector.extract_strided_slice %26 {offsets = [1, 0], sizes = [1, 128], strides = [1, 1]} : vector<2x128xf32> to vector<1x128xf32>
      %53 = vector.broadcast %52 : vector<1x128xf32> to vector<3x128xf32>
      %54 = arith.mulf %51, %53 : vector<3x128xf32>
      %cst_25 = arith.constant dense<0.000000e+00> : vector<3xf32>
      %55 = vector.multi_reduction <add>, %54, %cst_25 [1] : vector<3x128xf32> to vector<3xf32>
      %56 = vector.shape_cast %55 : vector<3xf32> to vector<3x1xf32>
      %c0_26 = arith.constant 0 : index
      %c0_27 = arith.constant 0 : index
      %57 = vector.load %arg5[%c0_26, %c0_27] : memref<6x1xf32, #tpu.memory_space<vmem>>, vector<6x1xf32>
      %58 = tpu.concatenate %50, %56 in 0 : vector<3x1xf32>, vector<3x1xf32> -> vector<6x1xf32>
      %59 = arith.addf %57, %58 : vector<6x1xf32>
      %c0_28 = arith.constant 0 : index
      %c0_29 = arith.constant 0 : index
      %60 = vector.load %arg5[%c0_28, %c0_29] : memref<6x1xf32, #tpu.memory_space<vmem>>, vector<6x1xf32>
      tpu.vector_store %arg5[%c0_28, %c0_29], %59 {strides = array<i32>} : memref<6x1xf32, #tpu.memory_space<vmem>>, vector<6x1xf32>,
    } else {
    }
    return
  }
  func.func @transform_0(%arg0: i32, %arg1: i32) -> (i32, i32) {
    %c0_i32 = arith.constant 0 : i32
    %c0_i32_0 = arith.constant 0 : i32
    return %c0_i32, %arg1 : i32, i32
  }
  func.func @transform_1(%arg0: i32, %arg1: i32) -> (i32, i32) {
    %0 = arith.muli %arg1, %arg0 : i32
    %c0_i32 = arith.constant 0 : i32
    %c0_i32_0 = arith.constant 0 : i32
    return %c0_i32, %0 : i32, i32
  }
  func.func @transform_2(%arg0: i32, %arg1: i32) -> (i32, i32) {
    %c0_i32 = arith.constant 0 : i32
    %c0_i32_0 = arith.constant 0 : i32
    %c0_i32_1 = arith.constant 0 : i32
    return %c0_i32, %c0_i32_0 : i32, i32
  }
  func.func @transform_3(%arg0: i32, %arg1: i32) -> (i32, i32) {
    %c0_i32 = arith.constant 0 : i32
    %c0_i32_0 = arith.constant 0 : i32
    %c0_i32_1 = arith.constant 0 : i32
    return %c0_i32, %c0_i32_0 : i32, i32
  }
  func.func @transform_4(%arg0: i32, %arg1: i32) -> (i32, i32) {
    %c0_i32 = arith.constant 0 : i32
    %c0_i32_0 = arith.constant 0 : i32
    %c0_i32_1 = arith.constant 0 : i32
    return %c0_i32, %c0_i32_0 : i32, i32
  }
}

</mosaic_0001>

<bundles_post_ra>
// kernel: squeeze.5
= control target key start
LH: loop header
LB: loop body
LE: loop exit
PB: predicated region body
PF: predicated region fallthrough
CT: control target
= control target key end

     0   :  { %2 = vsyncpa [#allocation1], 0  ;;  %s206_s6 = smov [#allocation0]   ;;  %s253_s0 = inlined_call_operand.hbm [shape: f32[2,1,16,18], index: 0, kind: input, shape index: {}]   ;;  %s254_s1 = inlined_call_operand.vmem [shape: f32[2,288], index: 1, kind: output, shape index: {}]  }
   0x1   :  { %s7_s7 = sshll.u32 %s206_s6, 4  ;;  %s182_s10 = scalar_lea.hbm %s253_s0, 512  ;;  %s8_s7 = int_to_ptr.vmem [resolvable:$true] %s7_s7 }
   0x2   :  { %p183_p0 = scmp.ne.s32.totalorder %s253_s0, %s182_s10  ;;  %p186_p1 = scmp.lt.u32.totalorder %s182_s10, %s253_s0 }
   0x4   :  { %p188_p2 = pnand %p186_p1, %p183_p0 }
   0x6   :  { %191 = shalt.err (!%p188_p2)
}
   0x7   :  { %s192_s15 = scalar_lea.vmem %s8_s7, 512  ;;  %p197_p4 = scmp.lt.s32.totalorder %s8_s7, %s8_s7 }
   0x8   :  { %p193_p3 = scmp.ne.s32.totalorder %s8_s7, %s192_s15  ;;  %p198_p5 = scmp.lt.s32.totalorder %s192_s15, %s192_s15 }
   0xa   :  { %p199_p6 = por %p198_p5, %p197_p4 }
   0xc   :  { %p200_p7 = pnand %p199_p6, %p193_p3 }
   0xe   :  { %203 = shalt.err (!%p200_p7)
}
   0xf   :  { %10 = dma.hbm_to_vmem [thread:$0]  %s253_s0, 512, %s8_s7, [#allocation1]  }
  0x10   :  { %204 = dma.done.wait [#allocation1], 512  }
  0x11   :  { %205 = vsyncadd [#allocation1], 4294966784  ;;  %s63_s0 = smov 3  ;;  %s48_s18 = smov 3  ;;  %vm22_vm0 = vcmask 15360   ;;  %vm37_vm1 = vcmask 31744  }
  0x12   :  { %s17_s19 = smov 3  ;;  %s20_s20 = smov 3  ;;  %v64_v0 = vld [vmem:[#allocation0 + $0x5] ss:$16 sm:%s63_s0]   ;;  %v49_v1 = vld [vmem:[#allocation0 + $0x6] ss:$16 sm:%s48_s18]  }
  0x13   :  { %s55_s21 = smov 3  ;;  %s32_s22 = smov 3  ;;  %v18_v2 = vld [vmem:[#allocation0 + $0x7] ss:$16 sm:%s17_s19]   ;;  %vm14_vm2 = vcmask 146432   ;;  %vm26_vm3 = vcmask 130048  }
  0x14   :  { %s35_s23 = smov 3  ;;  %s207_s24 = smov 90   ;;  %v21_v3 = vld [vmem:[#allocation0 + $0x7] ss:$16 sm:%s20_s20]   ;;  %v56_v5 = vld [vmem:[#allocation0 + $0xd] ss:$16 sm:%s55_s21]  }
  0x15   :  { %65 = vrot.lane.b32.xlu0 %v64_v0, %s207_s24  ;;  %s208_s25 = smov 108   ;;  %v23_v4 = vsel %vm22_vm0, %v21_v3, %v18_v2  ;;  %v33_v6 = vld [vmem:[#allocation0 + $0xe] ss:$16 sm:%s32_s22]   ;;  %s70_s26 = smov 3  ;;  %vm29_vm4 = vcmask 1048560   ;;  %vm52_vm5 = vcmask 1032032  }
  0x16   :  { %50 = vrot.lane.b32.xlu1 %v49_v1, %s208_s25  ;;  %v36_v7 = vld [vmem:[#allocation0 + $0xe] ss:$16 sm:%s35_s23]   ;;  %s209_s27 = smov 126   ;;  %s210_s28 = smov 106   ;;  %v71_v9 = vld [vmem:[#allocation0 + $0xc] ss:$16 sm:%s70_s26]  }
  0x17   :  { %v38_v8 = vsel %vm37_vm1, %v36_v7, %v33_v6  ;;  %s78_s29 = smov 3  ;;  %s85_s30 = smov 3  ;;  %vm67_vm6 = vcmask 884432   ;;  %vm41_vm7 = vcmask 113664   ;;  %vm44_vm8 = vcmask 1048544  }
  0x18   :  { %s211_s2 = smov 124   ;;  %s212_s3 = smov 88   ;;  %v79_v10 = vld [vmem:[#allocation0 + $0x4] ss:$16 sm:%s78_s29]   ;;  %v86_v11 = vld [vmem:[#allocation0 + $0xb] ss:$16 sm:%s85_s30]  }
  0x19   :  { %24 = vrot.lane.b32.xlu0 %v23_v4, %s209_s27  ;;  %s93_s4 = smov 3  ;;  %s100_s5 = smov 3  ;;  %vm59_vm9 = vcmask 1015632   ;;  %vm74_vm10 = vcmask 868032   ;;  %vm82_vm11 = vcmask 736832   ;;  %vm89_vm12 = vcmask 720432  }
  0x1a   :  { %57 = vrot.lane.b32.xlu1 %v56_v5, %s210_s28  ;;  %s12_s6 = smov 3  ;;  %s213_s7 = smov 72   ;;  %v94_v13 = vld [vmem:[#allocation0 + $0x3] ss:$16 sm:%s93_s4]   ;;  %v101_v14 = vld [vmem:[#allocation0 + $0xa] ss:$16 sm:%s100_s5]  }
  0x1b   :  { %v13_v12 = vld [vmem:[#allocation0] ss:$16 sm:%s12_s6]   ;;  %s214_s8 = smov 70   ;;  %s108_s9 = smov 3  ;;  %vm97_vm13 = vcmask 589232   ;;  %vm104_vm14 = vcmask 572832  }
  0x1c   :  { %15 = vst.msk [vmem:[#allocation2] sm:$0x3] %vm14_vm2, %v13_v12   ;;  %s115_s10 = smov 3  ;;  %s215_s11 = smov 54   ;;  %v109_v15 = vld [vmem:[#allocation0 + $0x2] ss:$16 sm:%s108_s9]  }
  0x1d   :  { %39 = vrot.lane.b32.xlu0 %v38_v8, %s211_s2  ;;  %s216_s12 = smov 52   ;;  %v116_v16 = vld [vmem:[#allocation0 + $0x9] ss:$16 sm:%s115_s10]   ;;  %s123_s13 = smov 3  ;;  %vm112_vm15 = vcmask 441632   ;;  %vm119_vm0 = vcmask 425232  }
  0x1e   :  { %72 = vrot.lane.b32.xlu1 %v71_v9, %s212_s3  ;;  %s130_s14 = smov 3  ;;  %s217_s15 = smov 36   ;;  %v124_v17 = vld [vmem:[#allocation0 + $0x1] ss:$16 sm:%s123_s13]   ;;  %vm127_vm1 = vcmask 294032   ;;  %vm134_vm2 = vcmask 277632  }
  0x1f   :  { %s218_s16 = smov 34   ;;  %v131_v18 = vld [vmem:[#allocation0 + $0x8] ss:$16 sm:%s130_s14]   ;;  %s138_s17 = smov 3 }
  0x20   :  { %s219_s0 = smov 18   ;;  %s220_s18 = smov 16   ;;  %v139_v19 = vld [vmem:[#allocation0 + $0xf] ss:$16 sm:%s138_s17]  }
  0x21   :  { %80 = vrot.lane.b32.xlu0 %v79_v10, %s213_s7  ;;  %s221_s19 = smov 14  }
  0x22   :  { %87 = vrot.lane.b32.xlu1 %v86_v11, %s214_s8 }
  0x25   :  { %95 = vrot.lane.b32.xlu0 %v94_v13, %s215_s11 }
  0x26   :  { %102 = vrot.lane.b32.xlu1 %v101_v14, %s216_s12 }
  0x29   :  { %110 = vrot.lane.b32.xlu0 %v109_v15, %s217_s15 }
  0x2a   :  { %117 = vrot.lane.b32.xlu1 %v116_v16, %s218_s16 }
  0x2d   :  { %125 = vrot.lane.b32.xlu0 %v124_v17, %s219_s0 }
  0x2e   :  { %132 = vrot.lane.b32.xlu1 %v131_v18, %s220_s18 }
  0x31   :  { %140 = vrot.lane.b32.xlu0 %v139_v19, %s221_s19 }
  0x87   :  { %v66_v20 = vpop.permute.xlu0 %65  }
  0x88   :  { %v51_v21 = vpop.permute.xlu1 %50  }
  0x8b   :  { %v25_v22 = vpop.permute.xlu0 %24  }
  0x8c   :  { %v58_v23 = vpop.permute.xlu1 %57   ;;  %28 = vst.msk [vmem:[#allocation2 + $0x8] sm:$0x3] %vm26_vm3, %v25_v22   ;;  %vm142_vm3 = vcmask 261232  }
  0x8d   :  { %30 = vst.msk [vmem:[#allocation2] sm:$0x3] %vm29_vm4, %v25_v22  }
  0x8e   :  { %53 = vst.msk [vmem:[#allocation2] sm:$0x3] %vm52_vm5, %v51_v21  }
  0x8f   :  { %68 = vst.msk [vmem:[#allocation2] sm:$0x3] %vm67_vm6, %v66_v20   ;;  %v40_v24 = vpop.permute.xlu0 %39  }
  0x90   :  { %v73_v25 = vpop.permute.xlu1 %72   ;;  %43 = vst.msk [vmem:[#allocation2 + $0x10] sm:$0x3] %vm41_vm7, %v40_v24  }
  0x91   :  { %46 = vst.msk [vmem:[#allocation2 + $0x8] sm:$0x3] %vm44_vm8, %v40_v24  }
  0x92   :  { %61 = vst.msk [vmem:[#allocation2 + $0x8] sm:$0x3] %vm59_vm9, %v58_v23  }
  0x93   :  { %76 = vst.msk [vmem:[#allocation2 + $0x8] sm:$0x3] %vm74_vm10, %v73_v25   ;;  %v81_v26 = vpop.permute.xlu0 %80  }
  0x94   :  { %v88_v27 = vpop.permute.xlu1 %87   ;;  %83 = vst.msk [vmem:[#allocation2] sm:$0x3] %vm82_vm11, %v81_v26  }
  0x95   :  { %91 = vst.msk [vmem:[#allocation2 + $0x8] sm:$0x3] %vm89_vm12, %v88_v27  }
  0x97   :  { %v96_v28 = vpop.permute.xlu0 %95  }
  0x98   :  { %v103_v29 = vpop.permute.xlu1 %102   ;;  %98 = vst.msk [vmem:[#allocation2] sm:$0x3] %vm97_vm13, %v96_v28  }
  0x99   :  { %106 = vst.msk [vmem:[#allocation2 + $0x8] sm:$0x3] %vm104_vm14, %v103_v29  }
  0x9b   :  { %v111_v30 = vpop.permute.xlu0 %110  }
  0x9c   :  { %v118_v31 = vpop.permute.xlu1 %117   ;;  %113 = vst.msk [vmem:[#allocation2] sm:$0x3] %vm112_vm15, %v111_v30  }
  0x9d   :  { %121 = vst.msk [vmem:[#allocation2 + $0x8] sm:$0x3] %vm119_vm0, %v118_v31  }
  0x9f   :  { %v126_v32 = vpop.permute.xlu0 %125  }
  0xa0   :  { %v133_v33 = vpop.permute.xlu1 %132   ;;  %128 = vst.msk [vmem:[#allocation2] sm:$0x3] %vm127_vm1, %v126_v32  }
  0xa1   :  { %136 = vst.msk [vmem:[#allocation2 + $0x8] sm:$0x3] %vm134_vm2, %v133_v33  }
  0xa3   :  { %v141_v34 = vpop.permute.xlu0 %140  }
  0xa4   :  { %144 = vst.msk [vmem:[#allocation2 + $0x10] sm:$0x3] %vm142_vm3, %v141_v34  }
  0xa7   :  { %v148_v35 = vld [vmem:[#allocation2] sm:$0x3] }
  0xa8   :  { %v152_v36 = vld [vmem:[#allocation2 + $0x8] sm:$0x3]  ;;  %150 = vst [vmem:[%s254_s1] sm:$0x3] %v148_v35 }
  0xa9   :  { %164 = vst [vmem:[%s254_s1 + $0x2] sm:$0x3] %v152_v36 }
  0xab   :  { %v157_v37 = vld [vmem:[#allocation2 + $0x10] sm:$0x3] }
  0xac   :  { %165 = vst [vmem:[%s254_s1 + $0x4] sm:$0x3] %v157_v37 }
  0xad   :  { %162 = vsyncpa [#allocation1], 1 }

// kernel: miou_loss.1
= control target key start
LH: loop header
LB: loop body
LE: loop exit
PB: predicated region body
PF: predicated region fallthrough
CT: control target
= control target key end

     0   :  { %s519_s15 = smov 0   ;;  %s521_s16 = smov 0   ;;  %s628_s0 = inlined_call_operand.vmem [shape: f32[6,288], index: 0, kind: input, shape index: {}]   ;;  %s629_s1 = inlined_call_operand.vmem [shape: f32[2,288], index: 1, kind: input, shape index: {}]   ;;  %s630_s2 = inlined_call_operand.vmem [shape: f32[6,1], index: 2, kind: output, shape index: {0}]   ;;  %s631_s3 = inlined_call_operand.vmem [shape: f32[6,1], index: 3, kind: output, shape index: {1}]   ;;  %s632_s4 = inlined_call_operand.vmem [shape: f32[2,1], index: 4, kind: output, shape index: {2}]  }
   0x1   :  { %s523_s17 = smov 0   ;;  %s525_s18 = smov 0  }
   0x2   :  { %s527_s19 = smov 0  }
   0x3 LB: > { %s24_s20 = sadd.s32 1, %s481_s17  ;;  %s27_s21 = sadd.s32 1, %s485_s18  ;;  %s489_s19 = sphi %s527_s19, %s15_s19   ;;  %s485_s18 = sphi %s525_s18, %s636_s18   ;;  %s481_s17 = sphi %s523_s17, %s635_s17   ;;  %s477_s16 = sphi %s521_s16, %s634_s16   ;;  %s473_s15 = sphi %s519_s15, %s633_s15  }
   0x4   : > { %p25_p0 = scmp.ge.s32.totalorder %s24_s20, 3  ;;  %p396_p1 = scmp.ge.s32.totalorder %s489_s19, 1 }
   0x5   : > { %p176_p2 = scmp.lt.s32.totalorder %s489_s19, 7 }
   0x6   : > { %s638_s20 = smov (%p25_p0, %s24_s20), 0  ;;  %s640_s21 = smov (!%p25_p0, %s27_s21), %s485_s18 }
   0x7   : > { %p177_p3 = pnand %p396_p1, %p176_p2  ;;  %p29_p4 = scmp.ge.s32.totalorder %s640_s21, 2 }
   0x8   : > { %p201_p5 = scmp.lt.s32.totalorder (!%p177_p3), %s473_s15, 2  ;;  %s205_s22 = smul.u32 (!%p177_p3), %s473_s15, %s477_s16 }
   0x9   : > { %s642_s21 = smov (%p29_p4, %s640_s21), 0  ;;  %180 = sbr.rel (%p177_p3) target bundleno = 499 (0x1f3), region = 28 }
   0xa   : > { %p211_p6 = scmp.eq.s32.totalorder (!%p177_p3), %s477_s16, 0  ;;  %p212_p7 = scmp.eq.s32.totalorder (!%p177_p3), %s473_s15, 0 }
   0xb   : > { %p206_p8 = scmp.lt.s32.totalorder (!%p177_p3), %s205_s22, 2 }
   0xc   : > { %p213_p9 = pnand (!%p177_p3), %p212_p7, %p211_p6 }
  0x10   : > { %s202_s23 = scalar_select %p201_p5, %s473_s15, 2 }
  0x11   : > { %s644_s22 = smov (!%p206_p8, %s205_s22), 2  ;;  %216 = sbr.rel (%p213_p9) target bundleno = 24 (0x18), region = 32 }
  0x12   : > { %s397_s24 = sshll.u32 %s202_s23, 3  ;;  %s398_s28 = sshll.u32 %s644_s22, 1  ;;  %vm217_vm0 = vcmask (!%p213_p9), 5120   ;;  %vm222_vm1 = vcmask (!%p213_p9), 1024   ;;  %v491_v0 = vmov (!%p213_p9), 0.0   ;;  %v492_v1 = vmov (!%p213_p9), inf  }
  0x13   : > { %s562_s27 = scalar_lea.vmem %s628_s0, %s397_s24  ;;  %s567_s5 = scalar_lea.vmem %s629_s1, %s398_s28  ;;  %218 = vst.msk [vmem:[#allocation2] sm:$0x3f] (!%p213_p9), %vm217_vm0, %v491_v0  ;;  %220 = vst.msk [vmem:[%s630_s2] sm:$0x3f] (!%p213_p9), %vm217_vm0, %v491_v0 }
  0x14   : > { %221 = vst.msk [vmem:[%s631_s3] sm:$0x3f] (!%p213_p9), %vm217_vm0, %v491_v0  ;;  %219 = vst.msk [vmem:[#allocation3] sm:$0x3f] (!%p213_p9), %vm217_vm0, %v492_v1 }
  0x15   : > { %223 = vst.msk [vmem:[%s632_s4] sm:$0x3] (!%p213_p9), %vm222_vm1, %v491_v0 }
  0x18 PF: > { %v224_v2 = vlaneseq  ;;  %s399_s12 = sshll.u32 %s473_s15, 7  ;;  %p400_p10 = scmp.ne.s32.totalorder %s477_s16, 0 }
  0x19   : > { %v227_v3 = vstv %s399_s12  ;;  %v233_v6 = vld [vmem:[%s562_s27] sm:$0x3f] (!%p400_p10)  ;;  %vm240_vm3 = vcmask (!%p400_p10), 1045504   ;;  %vm245_vm4 = vcmask (!%p400_p10), 5120   ;;  %p401_p11 = scmp.ne.s32.totalorder (!%p400_p10), %s473_s15, 2 }
  0x1a   : > { %v225_v4 = vand.u32 127, %v224_v2  ;;  %232 = sbr.rel (%p400_p10) target bundleno = 206 (0xce), region = 36  ;;  %v234_v7 = vmax.f32 (!%p400_p10), %v233_v6, 0.0  ;;  %v239_v12 = vld [vmem:[#allocation2] sm:$0x3f] (!%p400_p10) }
  0x1b   : > { %v247_v15 = vld [vmem:[#allocation3] sm:$0x3f] (!%p400_p10) }
  0x1c   : > { %v228_v5 = vadd.s32 %v227_v3, %v225_v4 }
  0x1e   : > { %vm229_vm2 = vcmp.lt.s32.totalorder %v228_v5, 288 }
  0x1f   : > { %v237_v8 = vsel (!%p400_p10), %vm229_vm2, %v234_v7, 0.0  ;;  %v238_v9 = vsel (!%p400_p10), %vm229_vm2, %v234_v7, inf }
  0x20   : > { %v241_v10 = vsel (!%p400_p10), %vm240_vm3, %v237_v8, -inf  ;;  %v248_v11 = vsel (!%p400_p10), %vm240_vm3, %v238_v9, inf }
  0x21   : > { %242 = vmax.xlane.f32.xlu0 %v241_v10 }
  0x25   : > { %249 = vmin.xlane.f32.xlu0 %v248_v11 }
  0xae   : > { %v243_v13 = vpop.xlane.xlu0 %242 }
  0xaf   : > { %v244_v14 = vmax.f32 %v239_v12, %v243_v13  ;;  %256 = sbr.rel (%p401_p11) target bundleno = 206 (0xce), region = 40 }
  0xb1   : > { %246 = vst.msk [vmem:[#allocation2] sm:$0x3f] %vm245_vm4, %v244_v14 }
  0xb2   : > { %v250_v16 = vpop.xlane.xlu0 %249 }
  0xb3   : > { %v251_v17 = vmin.f32 %v247_v15, %v250_v16 }
  0xb5   : > { %252 = vst.msk [vmem:[#allocation3] sm:$0x3f] %vm245_vm4, %v251_v17 }
  0xb8   : > { %v260_v19 = vld [vmem:[#allocation2] sm:$0x3f] }
  0xbc   : > { %v257_v18 = vld [vmem:[#allocation3] sm:$0x3f] }
  0xbd   : > { %v261_v20 = vld [vmem:[#allocation3] sm:$0x3f]  ;;  %v258_v21 = vadd.f32 1e-05, %v257_v18 }
  0xbe   : > { %v262_v22 = vsub.f32 %v260_v19, %v261_v20 }
  0xbf   : > { %259 = vst.msk [vmem:[#allocation4] sm:$0x3f] %vm245_vm4, %v258_v21 }
  0xc0   : > { %v263_v23 = vadd.f32 1e-05, %v262_v22 }
  0xc2   : > { %448 = vrcp.f32 %v263_v23 }
  0xcc   : > { %v449_v24 = vpop.eup %448 }
  0xcd   : > { %266 = vst.msk [vmem:[#allocation5] sm:$0x3f] %vm245_vm4, %v449_v24 }
  0xce PF: > { %p402_p12 = scmp.ne.s32.totalorder %s477_s16, 1 }
  0xcf   : > { %v277_v25 = vld [vmem:[#allocation4] sm:$0x3f] (!%p402_p12)  ;;  %v493_v26 = vmov (!%p402_p12), 0   ;;  %v271_v28 = vld [vmem:[%s562_s27] sm:$0x3f] (!%p402_p12)  ;;  %v309_v29 = vshrl.u32 (!%p402_p12), %v224_v2, 7 }
  0xd0   : > { %270 = sbr.rel (%p402_p12) target bundleno = 499 (0x1f3), region = 44  ;;  %450 = vset.pattern.permute.xlu0 (!%p402_p12), %v493_v26  ;;  %v272_v30 = vld [vmem:[%s567_s5] sm:$0x3] (!%p402_p12)  ;;  %v275_v31 = vsel (!%p402_p12), %vm229_vm2, %v271_v28, 0.0  ;;  %vm293_vm5 = vcmask (!%p402_p12), 1045504   ;;  %vm313_vm6 = vcmask (!%p402_p12), 1042432  }
  0xd1   : > { %280 = vperm.xlu0 (!%p402_p12), %450, %v277_v25   ;;  %v310_v32 = vsub.s32 (!%p402_p12), 0, %v309_v29  ;;  %v276_v34 = vsel (!%p402_p12), %vm229_vm2, %v272_v30, 0.0  ;;  %v319_v36 = vsub.s32 (!%p402_p12), 1, %v309_v29  ;;  %vm322_vm7 = vcmask (!%p402_p12), 1045507   ;;  %v292_v48 = vld [vmem:[%s630_s2] sm:$0x3f] (!%p402_p12) }
  0xd2   : > { %vm301_vm8 = vcmask (!%p402_p12), 1041408   ;;  %vm298_vm9 = vcmask (!%p402_p12), 5120   ;;  %v326_v52 = vld [vmem:[%s631_s3] sm:$0x3f] (!%p402_p12)  ;;  %vm306_vm10 = vcmask (!%p402_p12), 1024  }
  0xd3   : > { %v311_v38 = vrot.slane (!%p402_p12), %v276_v34, %v310_v32  ;;  %v320_v41 = vrot.slane (!%p402_p12), %v276_v34, %v319_v36  ;;  %v302_v47 = vsel (!%p402_p12), %vm301_vm8, %v276_v34, 0.0  ;;  %v300_v56 = vld [vmem:[%s632_s4] sm:$0x3] (!%p402_p12) }
  0xd4   : > { %v285_v27 = vld [vmem:[#allocation5] sm:$0x3f] (!%p402_p12) }
  0xd5   : > { %288 = vperm.xlu0 (!%p402_p12), %450, %v285_v27  }
 0x150   : > { %v281_v33 = vpop.permute.xlu0 %280 }
 0x151   : > { %v283_v35 = vsub.f32 %v275_v31, %v281_v33 }
 0x153   : > { %v284_v37 = vmax.f32 %v283_v35, 0.0 }
 0x154   : > { %v289_v39 = vpop.permute.xlu0 %288 }
 0x155   : > { %v291_v40 = vmul.f32 %v289_v39, %v284_v37 }
 0x157   : > { %v294_v42 = vsel %vm293_vm5, %v291_v40, 0.0  ;;  %v312_v43 = vmul.f32 %v311_v38, %v291_v40  ;;  %v321_v45 = vmul.f32 %v320_v41, %v291_v40 }
 0x158   : > { %295 = vadd.xlane.f32.xlu0 %v294_v42 }
 0x159   : > { %v314_v44 = vsel %vm313_vm6, %v312_v43, 0.0  ;;  %v323_v46 = vsel %vm322_vm7, %v321_v45, 0.0 }
 0x15a   : > { %315 = vadd.xlane.f32.xlu1 %v314_v44 }
 0x15e   : > { %324 = vadd.xlane.f32.xlu1 %v323_v46 }
 0x162   : > { %303 = vadd.xlane.f32.xlu1 %v302_v47 }
 0x1e5   : > { %v296_v49 = vpop.xlane.xlu0 %295 }
 0x1e6   : > { %v297_v50 = vadd.f32 %v296_v49, %v292_v48 }
 0x1e7   : > { %v316_v51 = vpop.xlane.xlu1 %315 }
 0x1e8   : > { %299 = vst.msk [vmem:[%s630_s2] sm:$0x3f] %vm298_vm9, %v297_v50 }
 0x1eb   : > { %v325_v53 = vpop.xlane.xlu1 %324 }
 0x1ec   : > { %v327_v54 = vsel %vm313_vm6, %v316_v51, %v325_v53 }
 0x1ed   : > { %v328_v55 = vadd.f32 %v327_v54, %v326_v52 }
 0x1ef   : > { %329 = vst.msk [vmem:[%s631_s3] sm:$0x3f] %vm298_vm9, %v328_v55  ;;  %v304_v57 = vpop.xlane.xlu1 %303 }
 0x1f0   : > { %v305_v58 = vadd.f32 %v304_v57, %v300_v56 }
 0x1f2   : > { %307 = vst.msk [vmem:[%s632_s4] sm:$0x3] %vm306_vm10, %v305_v58 }
 0x1f3 PF: > { %s15_s19 = sadd.s32 1, %s489_s19   ;;  %s633_s15 = smov %s481_s17 }
 0x1f4   : > { %p12_p13 = scmp.ge.s32.totalorder %s15_s19, 8   ;;  %s634_s16 = smov %s485_s18 }
 0x1f5   : > { %s635_s17 = smov %s638_s20  ;;  %s636_s18 = smov %s642_s21 }
 0x1f6   :  { %14 = sbr.rel (!%p12_p13) target bundleno = 3 (0x3), region = 89 }

</bundles_post_ra>
